<compile_context>
chip_gen: v7x
topology: tpu7x:2x2x1
jax: 0.10.0
libtpu: 0.0.40
codegen_flags: <defaults>
</compile_context>

<pallas_src>
import math
import jax
import jax.numpy as jnp
from jax.experimental import pallas as pl
from jax.experimental.pallas import tpu as pltpu


def token_embedding_kernel(x_ref, w_ref, o_ref):
    # x_ref: (Bt, L, C) native dtype; w_ref: (3, C, D) f32; o_ref: (Bt, L, D)
    w_prev = w_ref[0]  # (C, D): tap multiplying x[(t-1) mod L]
    w_cur = w_ref[1]   # (C, D): tap multiplying x[t]
    w_next = w_ref[2]  # (C, D): tap multiplying x[(t+1) mod L]

    Bt, L, _ = x_ref.shape
    # Static unroll over the fused batch elements: each iteration is an independent
    # (L, C) tile whose result is stored immediately (small live ranges). The MXU
    # work is negligible versus the HBM store stream, so per-element 2-D dots are
    # as fast as one big fused dot and keep the lowering on the simplest layout path.
    for b in range(Bt):
        x = x_ref[b].astype(jnp.float32)                # (L, C); widen after the DMA
        # Circular neighbours along the sequence axis (Conv1d padding=1, circular).
        # pltpu.roll matches jnp.roll: roll(x, s)[t] = x[(t - s) mod L].
        x_prev = pltpu.roll(x, shift=1, axis=0)          # x_prev[t] = x[(t-1) mod L]
        x_next = pltpu.roll(x, shift=L - 1, axis=0)      # x_next[t] = x[(t+1) mod L]

        out = jnp.dot(x_prev, w_prev, preferred_element_type=jnp.float32)
        out += jnp.dot(x, w_cur, preferred_element_type=jnp.float32)
        out += jnp.dot(x_next, w_next, preferred_element_type=jnp.float32)
        o_ref[b] = out.astype(o_ref.dtype)


def _vmem_sizing():
    """Per-generation scoped-VMEM limit and block budget (bytes)."""
    try:
        cap = pltpu.get_tpu_info().vmem_capacity_bytes
    except Exception:
        cap = 64 * 1024 * 1024  # assume the smallest generation (v7x) if query fails
    # 48 MiB on v7x (64 MiB physical), 96 MiB on v5e/v6e (128 MiB physical).
    limit = min((cap * 3) // 4, 96 * 1024 * 1024)
    budget = (limit * 4) // 5   # headroom for compiler scratch / double buffers
    return int(limit), int(budget)


def _choose_bt(B, L, C, D, x_itemsize, out_itemsize, budget_bytes):
    """Largest batch-fusion factor Bt (a divisor of B) that fits the VMEM budget,
    preferring an even grid length >= 2 so v7x's two TensorCores both get work."""
    def step_bytes(bt):
        inp = 2 * bt * L * C * x_itemsize          # double-buffered input blocks
        out = 2 * bt * L * D * out_itemsize        # double-buffered output blocks
        w = 3 * C * D * 4                          # resident f32 weight
        interm = bt * L * (3 * C + D) * 4          # conservative f32 intermediates
        return inp + out + w + interm

    divisors = sorted({d for d in range(1, B + 1) if B % d == 0}, reverse=True)
    for require_even_grid in (True, False):
        for bt in divisors:
            g = B // bt
            if require_even_grid and (g < 2 or g % 2 != 0):
                continue
            if step_bytes(bt) <= budget_bytes:
                return bt
    return 1


def prepare_weight(w):
    """One-time weight prep: (3, C, D), contiguous, float32 (matches torch's f32 conv)."""
    assert w.ndim == 3 and w.shape[0] == 3, "expected weight of shape (3, c_in, d_model)"
    return jnp.asarray(w, dtype=jnp.float32)


def token_embedding(x, w, *, out_dtype=jnp.float32):
    """x: (B, L, C) any float dtype; w: (3, C, D) with w[k, c, d] == torch_w[d, c, k].

    Returns (B, L, D) in `out_dtype` (f32 default, matching the PyTorch module which
    casts the input to float before the conv; pass jnp.bfloat16 on v5e to halve the
    dominant output-store stream if downstream tolerates it).
    """
    B, L, C = x.shape
    K, Cw, D = w.shape
    assert K == 3 and Cw == C
    w = prepare_weight(w)

    vmem_limit, vmem_budget = _vmem_sizing()
    out_itemsize = jnp.dtype(out_dtype).itemsize
    Bt = _choose_bt(B, L, C, D, x.dtype.itemsize, out_itemsize, vmem_budget)

    return pl.pallas_call(
        token_embedding_kernel,
        out_shape=jax.ShapeDtypeStruct((B, L, D), out_dtype),
        grid_spec=pltpu.PrefetchScalarGridSpec(
            num_scalar_prefetch=0,
            grid=(B // Bt,),
            in_specs=[
                pl.BlockSpec((Bt, L, C), lambda i: (i, 0, 0)),   # native-dtype DMA
                pl.BlockSpec((3, C, D), lambda i: (0, 0, 0)),    # resident across grid
            ],
            out_specs=pl.BlockSpec((Bt, L, D), lambda i: (i, 0, 0)),
        ),
        compiler_params=pltpu.CompilerParams(
            dimension_semantics=("parallel",),
            vmem_limit_bytes=vmem_limit,
        ),
    )(x, w)


def init_weight(key, c_in, d_model, kernel_size=3):
    # kaiming_normal_(mode='fan_in', nonlinearity='leaky_relu', a=0):
    # gain = sqrt(2), std = gain / sqrt(fan_in), fan_in = c_in * kernel_size
    fan_in = c_in * kernel_size
    std = math.sqrt(2.0) / math.sqrt(fan_in)
    # torch weight shape: (d_model, c_in, k). Kernel wants (k, c_in, d_model).
    w_torch = std * jax.random.normal(key, (d_model, c_in, kernel_size), jnp.float32)
    return jnp.transpose(w_torch, (2, 1, 0))  # (k, c_in, d_model)


def reference(x, w):
    # Pure-JAX reference of the circular conv, channels-last, f32 accumulation.
    xf = x.astype(jnp.float32)
    wf = w.astype(jnp.float32)
    x_pad = jnp.concatenate([xf[:, -1:, :], xf, xf[:, :1, :]], axis=1)  # (B, L+2, C)
    L = x.shape[1]
    return sum(jnp.einsum('blc,cd->bld', x_pad[:, k:k + L, :], wf[k]) for k in range(3))


if __name__ == "__main__":
    key = jax.random.PRNGKey(0)
    kx1, kx2, kw1, kw2 = jax.random.split(key, 4)

    # Test 1: f32 input, L NOT a multiple of 8 (validates circular roll on a
    # sublane-padded tile), batch fusion gives grid=(2,) with Bt=2.
    B, L, c_in, d_model = 4, 12, 4, 32
    x = jax.random.normal(kx1, (B, L, c_in), jnp.float32)
    w = init_weight(kw1, c_in, d_model)
    out = jax.block_until_ready(token_embedding(x, w))
    ref = reference(x, w)
    assert out.shape == (B, L, d_model)
    assert jnp.allclose(out, ref, atol=1e-5, rtol=1e-5), "test1: f32 mismatch vs reference"

    # Test 2: odd c_in, d_model not a multiple of 128 (masked tail store, no padding
    # or post-slice), L a multiple of 8.
    B2, L2, c2, d2 = 2, 16, 7, 96
    x2 = jax.random.normal(kx2, (B2, L2, c2), jnp.float32)
    w2 = init_weight(kw2, c2, d2)
    out2 = jax.block_until_ready(token_embedding(x2, w2))
    ref2 = reference(x2, w2)
    assert out2.shape == (B2, L2, d2)
    assert jnp.allclose(out2, ref2, atol=1e-5, rtol=1e-5), "test2: f32 mismatch vs reference"

    # Test 3: bf16 input path (native-dtype DMA). The kernel widens to f32 before all
    # compute, so it must match the f32 reference of the bf16-cast input tightly.
    x_bf = x.astype(jnp.bfloat16)
    out_bf = jax.block_until_ready(token_embedding(x_bf, w))
    ref_bf = reference(x_bf.astype(jnp.float32), w)
    assert jnp.allclose(out_bf, ref_bf, atol=1e-5, rtol=1e-5), "test3: bf16-input mismatch"

    print("KERNEL_OK")
</pallas_src>

<mosaic_0001>
module attributes {stable_mosaic.version = 11 : i64} {
  func.func @token_embedding_kernel(%arg0: i32, %arg1: memref<2x12x4xf32, #tpu.memory_space<vmem>>, %arg2: memref<3x4x32xf32, #tpu.memory_space<vmem>>, %arg3: memref<2x12x32xf32, #tpu.memory_space<vmem>>) attributes {dimension_semantics = [#tpu.dimension_semantics<parallel>], iteration_bounds = array<i64: 2>, scalar_prefetch = 0 : i64, scratch_operands = 0 : i64, tpu.core_type = #tpu.core_type<tc>, window_params = [{transform_indices = @transform_0, window_bounds = array<i64: 2, 12, 4>}, {pipeline_mode = #tpu.pipeline_mode<synchronous>, transform_indices = @transform_1, window_bounds = array<i64: 3, 4, 32>}, {transform_indices = @transform_2, window_bounds = array<i64: 2, 12, 32>}]} {
    %c0 = arith.constant 0 : index
    %c0_0 = arith.constant 0 : index
    %c0_1 = arith.constant 0 : index
    %0 = vector.load %arg2[%c0, %c0_0, %c0_1] : memref<3x4x32xf32, #tpu.memory_space<vmem>>, vector<1x4x32xf32>
    %1 = vector.shape_cast %0 : vector<1x4x32xf32> to vector<4x32xf32>
    %c1 = arith.constant 1 : index
    %c0_2 = arith.constant 0 : index
    %c0_3 = arith.constant 0 : index
    %2 = vector.load %arg2[%c1, %c0_2, %c0_3] : memref<3x4x32xf32, #tpu.memory_space<vmem>>, vector<1x4x32xf32>
    %3 = vector.shape_cast %2 : vector<1x4x32xf32> to vector<4x32xf32>
    %c2 = arith.constant 2 : index
    %c0_4 = arith.constant 0 : index
    %c0_5 = arith.constant 0 : index
    %4 = vector.load %arg2[%c2, %c0_4, %c0_5] : memref<3x4x32xf32, #tpu.memory_space<vmem>>, vector<1x4x32xf32>
    %5 = vector.shape_cast %4 : vector<1x4x32xf32> to vector<4x32xf32>
    %c0_6 = arith.constant 0 : index
    %c0_7 = arith.constant 0 : index
    %c0_8 = arith.constant 0 : index
    %6 = vector.load %arg1[%c0_6, %c0_7, %c0_8] : memref<2x12x4xf32, #tpu.memory_space<vmem>>, vector<1x12x4xf32>
    %7 = vector.shape_cast %6 : vector<1x12x4xf32> to vector<12x4xf32>
    %c1_i32 = arith.constant 1 : i32
    %8 = tpu.dynamic_rotate %7 by %c1_i32 dim 0 : vector<12x4xf32>, i32 -> vector<12x4xf32>
    %c11_i32 = arith.constant 11 : i32
    %9 = tpu.dynamic_rotate %7 by %c11_i32 dim 0 : vector<12x4xf32>, i32 -> vector<12x4xf32>
    %cst = arith.constant dense<0.000000e+00> : vector<12x32xf32>
    %10 = tpu.matmul %8, %1, %cst {dimension_numbers = #tpu.dot_dimension_numbers<[1], [0], [0], [1], [0, 0, 1, 1], [], []>} : vector<12x4xf32>, vector<4x32xf32>, vector<12x32xf32> -> vector<12x32xf32>
    %cst_9 = arith.constant dense<0.000000e+00> : vector<12x32xf32>
    %11 = tpu.matmul %7, %3, %cst_9 {dimension_numbers = #tpu.dot_dimension_numbers<[1], [0], [0], [1], [0, 0, 1, 1], [], []>} : vector<12x4xf32>, vector<4x32xf32>, vector<12x32xf32> -> vector<12x32xf32>
    %12 = arith.addf %10, %11 : vector<12x32xf32>
    %cst_10 = arith.constant dense<0.000000e+00> : vector<12x32xf32>
    %13 = tpu.matmul %9, %5, %cst_10 {dimension_numbers = #tpu.dot_dimension_numbers<[1], [0], [0], [1], [0, 0, 1, 1], [], []>} : vector<12x4xf32>, vector<4x32xf32>, vector<12x32xf32> -> vector<12x32xf32>
    %14 = arith.addf %12, %13 : vector<12x32xf32>
    %c0_11 = arith.constant 0 : index
    %c0_12 = arith.constant 0 : index
    %c0_13 = arith.constant 0 : index
    %15 = vector.load %arg3[%c0_11, %c0_12, %c0_13] : memref<2x12x32xf32, #tpu.memory_space<vmem>>, vector<1x12x32xf32>
    %16 = vector.shape_cast %15 : vector<1x12x32xf32> to vector<12x32xf32>
    %17 = vector.shape_cast %14 : vector<12x32xf32> to vector<1x12x32xf32>
    tpu.vector_store %arg3[%c0_11, %c0_12, %c0_13], %17 {strides = array<i32>} : memref<2x12x32xf32, #tpu.memory_space<vmem>>, vector<1x12x32xf32>,
    %c1_14 = arith.constant 1 : index
    %c0_15 = arith.constant 0 : index
    %c0_16 = arith.constant 0 : index
    %18 = vector.load %arg1[%c1_14, %c0_15, %c0_16] : memref<2x12x4xf32, #tpu.memory_space<vmem>>, vector<1x12x4xf32>
    %19 = vector.shape_cast %18 : vector<1x12x4xf32> to vector<12x4xf32>
    %c1_i32_17 = arith.constant 1 : i32
    %20 = tpu.dynamic_rotate %19 by %c1_i32_17 dim 0 : vector<12x4xf32>, i32 -> vector<12x4xf32>
    %c11_i32_18 = arith.constant 11 : i32
    %21 = tpu.dynamic_rotate %19 by %c11_i32_18 dim 0 : vector<12x4xf32>, i32 -> vector<12x4xf32>
    %cst_19 = arith.constant dense<0.000000e+00> : vector<12x32xf32>
    %22 = tpu.matmul %20, %1, %cst_19 {dimension_numbers = #tpu.dot_dimension_numbers<[1], [0], [0], [1], [0, 0, 1, 1], [], []>} : vector<12x4xf32>, vector<4x32xf32>, vector<12x32xf32> -> vector<12x32xf32>
    %cst_20 = arith.constant dense<0.000000e+00> : vector<12x32xf32>
    %23 = tpu.matmul %19, %3, %cst_20 {dimension_numbers = #tpu.dot_dimension_numbers<[1], [0], [0], [1], [0, 0, 1, 1], [], []>} : vector<12x4xf32>, vector<4x32xf32>, vector<12x32xf32> -> vector<12x32xf32>
    %24 = arith.addf %22, %23 : vector<12x32xf32>
    %cst_21 = arith.constant dense<0.000000e+00> : vector<12x32xf32>
    %25 = tpu.matmul %21, %5, %cst_21 {dimension_numbers = #tpu.dot_dimension_numbers<[1], [0], [0], [1], [0, 0, 1, 1], [], []>} : vector<12x4xf32>, vector<4x32xf32>, vector<12x32xf32> -> vector<12x32xf32>
    %26 = arith.addf %24, %25 : vector<12x32xf32>
    %c1_22 = arith.constant 1 : index
    %c0_23 = arith.constant 0 : index
    %c0_24 = arith.constant 0 : index
    %27 = vector.load %arg3[%c1_22, %c0_23, %c0_24] : memref<2x12x32xf32, #tpu.memory_space<vmem>>, vector<1x12x32xf32>
    %28 = vector.shape_cast %27 : vector<1x12x32xf32> to vector<12x32xf32>
    %29 = vector.shape_cast %26 : vector<12x32xf32> to vector<1x12x32xf32>
    tpu.vector_store %arg3[%c1_22, %c0_23, %c0_24], %29 {strides = array<i32>} : memref<2x12x32xf32, #tpu.memory_space<vmem>>, vector<1x12x32xf32>,
    return
  }
  func.func @transform_0(%arg0: i32) -> (i32, i32, i32) {
    %c0_i32 = arith.constant 0 : i32
    %c0_i32_0 = arith.constant 0 : i32
    %c0_i32_1 = arith.constant 0 : i32
    return %arg0, %c0_i32, %c0_i32_0 : i32, i32, i32
  }
  func.func @transform_1(%arg0: i32) -> (i32, i32, i32) {
    %c0_i32 = arith.constant 0 : i32
    %c0_i32_0 = arith.constant 0 : i32
    %c0_i32_1 = arith.constant 0 : i32
    %c0_i32_2 = arith.constant 0 : i32
    return %c0_i32, %c0_i32_0, %c0_i32_1 : i32, i32, i32
  }
  func.func @transform_2(%arg0: i32) -> (i32, i32, i32) {
    %c0_i32 = arith.constant 0 : i32
    %c0_i32_0 = arith.constant 0 : i32
    %c0_i32_1 = arith.constant 0 : i32
    return %arg0, %c0_i32, %c0_i32_0 : i32, i32, i32
  }
}

</mosaic_0001>

<bundles_post_ra>
// kernel: tpu_custom_call.1
= control target key start
LH: loop header
LB: loop body
LE: loop exit
PB: predicated region body
PF: predicated region fallthrough
CT: control target
= control target key end

     0   :  { %s873_s9 = smov 0   ;;  %s934_s0 = inlined_call_operand.vmem [shape: f32[4,12,4], index: 0, kind: input, shape index: {}]   ;;  %s935_s1 = inlined_call_operand.vmem [shape: f32[3,4,32], index: 1, kind: input, shape index: {}]   ;;  %s936_s2 = inlined_call_operand.vmem [shape: f32[4,12,32], index: 2, kind: output, shape index: {}]  }
   0x1 LB: > { %s747_s10 = sadd.s32 4294967295, %s856_s9   ;;  %p751_p0 = scmp.ge.s32.totalorder %s856_s9, 1  ;;  %s856_s9 = sphi %s873_s9, %s12_s9  }
   0x2   : > { %p114_p1 = scmp.lt.s32.totalorder %s856_s9, 3 }
   0x4   : > { %p115_p2 = pnand %p751_p0, %p114_p1 }
   0x5   : > { %v758_v0 = vld [vmem:[%s935_s1 + $0x4] sm:$0xf] (!%p115_p2)  ;;  %vm171_vm0 = vcmask (!%p115_p2), 1043456   ;;  %s752_s13 = sshll.u32 (!%p115_p2), %s747_s10, 1  ;;  %v152_v1 = vld [vmem:[%s935_s1] sm:$0xf] (!%p115_p2) }
   0x6   : > { %118 = sbr.rel (%p115_p2) target bundleno = 249 (0xf9), region = 28  ;;  %804 = vmatprep.subr.msk.mxu0 (!%p115_p2), %vm171_vm0, %v758_v0  ;;  %819 = vmatprep.subr.msk.mxu1 (!%p115_p2), %vm171_vm0, %v758_v0  ;;  %p139_p3 = scmp.lt.s32.totalorder (!%p115_p2), %s752_s13, 3  ;;  %vm164_vm1 = vcmask (!%p115_p2), 31744   ;;  %vm159_vm2 = vcmask (!%p115_p2), 1047556   ;;  %v759_v8 = vld [vmem:[%s935_s1 + $0x8] sm:$0xf] (!%p115_p2) }
   0x7   : > { %805 = vmatpush3.msk.msra.mxu0 (!%p115_p2), %vm171_vm0, %v758_v0  ;;  %820 = vmatpush3.msk.msra.mxu1 (!%p115_p2), %vm171_vm0, %v758_v0  ;;  %vm252_vm3 = vcmask (!%p115_p2), 1044480   ;;  %vm338_vm4 = vcmask (!%p115_p2), 1046528   ;;  %vm428_vm5 = vcmask (!%p115_p2), 257024   ;;  %vm426_vm6 = vcmask (!%p115_p2), 261120  }
   0x8   : > { %809 = vmatprep.subr.msk.mxu0 (!%p115_p2), %vm171_vm0, %v152_v1  ;;  %824 = vmatprep.subr.msk.mxu1 (!%p115_p2), %vm171_vm0, %v152_v1 }
   0xd   : > { %s938_s13 = smov (!%p139_p3, %s752_s13), 3 }
   0xe   : > { %s784_s16 = sshll.u32 %s938_s13, 4 }
   0xf   : > { %s143_s19 = scalar_lea.vmem %s934_s0, %s784_s16  ;;  %s150_s24 = scalar_lea.vmem %s936_s2, %s784_s16 }
  0x10   : > { %v157_v2 = vld [vmem:[%s143_s19] sm:$0xff]  ;;  %v769_v3 = vld [vmem:[%s143_s19 + $0x10] sm:$0xff]  ;;  %v158_v4 = vld [vmem:[%s143_s19 + $0x8] sm:$0xf] }
  0x11   : > { %v160_v5 = vrot.slane %v157_v2, 4  ;;  %806 = vmatprep.mubr.msk.f32.mxu0 %vm164_vm1, %v157_v2  ;;  %v433_v6 = vrot.slane %v769_v3, 4  ;;  %821 = vmatprep.mubr.msk.f32.mxu1 %vm164_vm1, %v769_v3  ;;  %v770_v7 = vld [vmem:[%s143_s19 + $0x18] sm:$0xf]  ;;  %v339_v13 = vrot.slane %v157_v2, 1  ;;  %v602_v14 = vrot.slane %v769_v3, 1 }
  0x12   : > { %807 = vmatmul.mubr.msk.f32.vlgmr.msra.gmra.mrb[0].mxu0 %vm164_vm1, %v158_v4  ;;  %822 = vmatmul.mubr.msk.f32.vlgmr.msra.gmra.mrb[0].mxu1 %vm164_vm1, %v770_v7 }
  0x13   : > { %v161_v9 = vsel %vm159_vm2, %v160_v5, %v158_v4  ;;  %810 = vmatpush3.msk.msra.mxu0 %vm171_vm0, %v152_v1  ;;  %v434_v10 = vsel %vm159_vm2, %v433_v6, %v770_v7  ;;  %825 = vmatpush3.msk.msra.mxu1 %vm171_vm0, %v152_v1 }
  0x14   : > { %v162_v11 = vrot.slane %v161_v9, 4  ;;  %v435_v12 = vrot.slane %v434_v10, 4  ;;  %814 = vmatprep.subr.msk.mxu0 %vm171_vm0, %v759_v8  ;;  %829 = vmatprep.subr.msk.mxu1 %vm171_vm0, %v759_v8  ;;  %v253_v15 = vrot.slane %v161_v9, 3  ;;  %v520_v16 = vrot.slane %v434_v10, 3 }
  0x15   : > { %v340_v19 = vrot.slane %v161_v9, 1  ;;  %v603_v20 = vrot.slane %v434_v10, 1 }
  0x16   : > { %v163_v17 = vsel %vm159_vm2, %v162_v11, %v160_v5  ;;  %v436_v18 = vsel %vm159_vm2, %v435_v12, %v433_v6 }
  0x17   : > { %v254_v21 = vrot.slane %v163_v17, 3  ;;  %v521_v22 = vrot.slane %v436_v18, 3  ;;  %v341_v25 = vsel %vm338_vm4, %v339_v13, %v340_v19  ;;  %v604_v26 = vsel %vm338_vm4, %v602_v14, %v603_v20 }
  0x19   : > { %v255_v23 = vsel %vm252_vm3, %v253_v15, %v254_v21  ;;  %v522_v24 = vsel %vm252_vm3, %v520_v16, %v521_v22 }
  0x1a   : > { %811 = vmatprep.mubr.msk.f32.mxu0 %vm164_vm1, %v255_v23  ;;  %826 = vmatprep.mubr.msk.f32.mxu1 %vm164_vm1, %v522_v24 }
  0x1b   : > { %812 = vmatmul.mubr.msk.f32.vlgmr.msra.gmra.mrb[0].mxu0 %vm164_vm1, %v254_v21  ;;  %827 = vmatmul.mubr.msk.f32.vlgmr.msra.gmra.mrb[0].mxu1 %vm164_vm1, %v521_v22 }
  0x1c   : > { %815 = vmatpush3.msk.msra.mxu0 %vm171_vm0, %v759_v8  ;;  %830 = vmatpush3.msk.msra.mxu1 %vm171_vm0, %v759_v8 }
  0x1d   : > { %816 = vmatprep.mubr.msk.f32.mxu0 %vm164_vm1, %v341_v25  ;;  %831 = vmatprep.mubr.msk.f32.mxu1 %vm164_vm1, %v604_v26 }
  0x23   : > { %817 = vmatmul.mubr.msk.f32.vlgmr.msra.gmra.mrb[0].mxu0 %vm164_vm1, %v340_v19  ;;  %832 = vmatmul.mubr.msk.f32.vlgmr.msra.gmra.mrb[0].mxu1 %vm164_vm1, %v603_v20 }
  0xf6   : > { %v818_v27 = vpop.f32.mrb[0].mxu0  ;;  %v833_v28 = vpop.f32.mrb[0].mxu1 }
  0xf7   : > { %429 = vst.msk [vmem:[%s150_s24 + $0x8] sm:$0xf] %vm428_vm5, %v818_v27  ;;  %v415_v29 = vpop.f32.mrb[1].mxu0  ;;  %v675_v30 = vpop.f32.mrb[1].mxu1  ;;  %781 = vst.msk [vmem:[%s150_s24 + $0x18] sm:$0xf] %vm428_vm5, %v833_v28 }
  0xf8   : > { %427 = vst.msk [vmem:[%s150_s24] sm:$0xff] %vm426_vm6, %v415_v29  ;;  %780 = vst.msk [vmem:[%s150_s24 + $0x10] sm:$0xff] %vm426_vm6, %v675_v30 }
  0xf9 PF: > { %s12_s9 = sadd.s32 1, %s856_s9  }
  0xfa   : > { %p9_p4 = scmp.ge.s32.totalorder %s12_s9, 4  }
  0xfc   :  { %11 = sbr.rel (!%p9_p4) target bundleno = 1 (0x1), region = 62 }

</bundles_post_ra>
